<compile_context>
chip_gen: v6e
topology: v6e:2x2x1
jax: 0.10.0
libtpu: 0.0.40
codegen_flags: <defaults>
</compile_context>

<pallas_src>
import numpy as np
import jax
import jax.numpy as jnp
from jax.experimental import pallas as pl
from jax.experimental.pallas import tpu as pltpu


def _build_level_selectors(max_depth: int):
    """Static per-level routing selectors (heap node indexing).

    sel_right[d*NL + l, n] = 1  if internal node n is leaf l's ancestor at tree
                                 level d and leaf l's path goes RIGHT at n.
    sel_left [d*NL + l, n] = 1  same, but the path goes LEFT at n.
    Exactly one of the two is 1 for every (level, leaf) pair.
    """
    num_internal = 2 ** max_depth - 1
    num_leaves = 2 ** max_depth
    sel_right = np.zeros((max_depth * num_leaves, num_internal), dtype=np.float32)
    sel_left = np.zeros((max_depth * num_leaves, num_internal), dtype=np.float32)
    for leaf in range(num_leaves):
        node = 0
        for d in range(max_depth):
            bit = (leaf >> (max_depth - 1 - d)) & 1     # MSB-first: 1 = right
            if bit:
                sel_right[d * num_leaves + leaf, node] = 1.0
            else:
                sel_left[d * num_leaves + leaf, node] = 1.0
            node = 2 * node + 1 + bit
        assert node - num_internal == leaf
    return sel_right, sel_left


def _ddt_kernel(xT_ref, w_ref, b_ref, a_ref, selR_ref, selL_ref, pdT_ref, out_ref):
    # Gate value of every internal node, batch on lanes:
    #   vals[n, b] = sigmoid(alpha_n * (W_n . x_b + bias_n))        (NI, TB)
    logits = jnp.dot(w_ref[...], xT_ref[...], preferred_element_type=jnp.float32)
    vals = jax.nn.sigmoid(a_ref[...] * (logits + b_ref[...]))

    # Hard routing (torch: val >= 0.5 -> right).  Gate survives only on the
    # direction actually taken; the other direction contributes 0.
    go_right = vals >= 0.5
    right_t = jnp.where(go_right, vals, 0.0)          # (NI, TB)
    left_t = jnp.where(go_right, 0.0, 1.0 - vals)     # (NI, TB)

    # For every (tree level d, leaf l): the gate of leaf l's ancestor at level
    # d, already masked by the hard route.  One small matmul per direction.
    levels = (jnp.dot(selR_ref[...], right_t, preferred_element_type=jnp.float32)
              + jnp.dot(selL_ref[...], left_t, preferred_element_type=jnp.float32))
    # levels: (max_depth * NL, TB)

    num_leaves = pdT_ref.shape[1]
    max_depth = selR_ref.shape[0] // num_leaves

    # Product over the max_depth path levels -> exactly one leaf per batch
    # column keeps a nonzero weight.  Depth-long multiply chain (not 2^d-1).
    leaf_w = levels[0:num_leaves, :]
    for d in range(1, max_depth):
        leaf_w = leaf_w * levels[d * num_leaves:(d + 1) * num_leaves, :]

    # Weighted sum of leaf distributions; lane-dense (num_output, TB) store.
    out_ref[...] = jnp.dot(pdT_ref[...], leaf_w, preferred_element_type=jnp.float32)


def ddt_forward(x, W, bias, alpha, sel_right, sel_left, prob_dist, *, tb=128):
    """Batched DDT forward.  x: (B, num_input) -> (B, num_output)."""
    B, num_input = x.shape
    num_internal = W.shape[0]
    num_leaves, num_output = prob_dist.shape
    dnl = sel_right.shape[0]                      # max_depth * num_leaves

    # Lane-major layouts: batch on the lane (last) axis everywhere.
    B_pad = pl.cdiv(B, tb) * tb
    xT = jnp.transpose(x)                         # (num_input, B)
    if B_pad != B:
        xT = jnp.pad(xT, ((0, 0), (0, B_pad - B)))
    pdT = jnp.transpose(prob_dist)                # (num_output, num_leaves)

    resident = lambda shape: pl.BlockSpec(shape, lambda i: tuple(0 for _ in shape))

    outT = pl.pallas_call(
        _ddt_kernel,
        out_shape=jax.ShapeDtypeStruct((num_output, B_pad), jnp.float32),
        grid=(B_pad // tb,),
        in_specs=[
            pl.BlockSpec((num_input, tb), lambda i: (0, i)),   # x streams per tile
            resident((num_internal, num_input)),               # W        (resident)
            resident((num_internal, 1)),                       # bias     (resident)
            resident((num_internal, 1)),                       # alpha    (resident)
            resident((dnl, num_internal)),                     # sel_right(resident)
            resident((dnl, num_internal)),                     # sel_left (resident)
            resident((num_output, num_leaves)),                # prob_dist^T
        ],
        out_specs=pl.BlockSpec((num_output, tb), lambda i: (0, i)),
        compiler_params=pltpu.CompilerParams(
            dimension_semantics=("parallel",)),                # megacore on v7x
    )(xT, W, bias, alpha, sel_right, sel_left, pdT)

    return jnp.transpose(outT[:, :B])             # (B, num_output)


def ddt_reference(x, W, bias, alpha, prob_dist, max_depth):
    """Direct numpy transcription of the recursive PyTorch forward.

    Also returns the minimum |val - 0.5| routing margin along the taken path
    (knife-edge ties are implementation-defined across float backends).
    """
    num_internal = 2 ** max_depth - 1
    node = 0
    acc = 1.0
    margin = np.inf
    for _ in range(max_depth):
        z = alpha[node, 0] * (x @ W[node] + bias[node, 0])
        val = 1.0 / (1.0 + np.exp(-z))
        margin = min(margin, abs(val - 0.5))
        if val >= 0.5:
            acc *= val
            node = 2 * node + 2
        else:
            acc *= 1.0 - val
            node = 2 * node + 1
    return acc * prob_dist[node - num_internal], margin


if __name__ == "__main__":
    num_input, num_output, max_depth = 32, 8, 3
    num_internal = 2 ** max_depth - 1
    num_leaves = 2 ** max_depth
    B = 200                                       # non-multiple of the 128 tile

    key = jax.random.PRNGKey(0)
    k_x, k_w, k_b, k_a, k_p = jax.random.split(key, 5)

    # Parameter shapes follow DDTNode.__init__ (one row per tree node).  The
    # module inits bias/alpha/prob_dist to zero; we use small deterministic
    # random values so routing / gating is actually exercised.
    x = jax.random.normal(k_x, (B, num_input), dtype=jnp.float32)
    W = 0.1 * jax.random.normal(k_w, (num_internal, num_input), dtype=jnp.float32)
    bias = 0.1 * jax.random.normal(k_b, (num_internal, 1), dtype=jnp.float32)
    alpha = jax.random.normal(k_a, (num_internal, 1), dtype=jnp.float32)
    prob_dist = jax.random.normal(k_p, (num_leaves, num_output), dtype=jnp.float32)

    selR_np, selL_np = _build_level_selectors(max_depth)
    sel_right = jnp.asarray(selR_np)
    sel_left = jnp.asarray(selL_np)

    out = ddt_forward(x, W, bias, alpha, sel_right, sel_left, prob_dist)
    out = jax.block_until_ready(out)
    out_np = np.asarray(out)

    xn, Wn = np.asarray(x), np.asarray(W)
    bn, an, pdn = np.asarray(bias), np.asarray(alpha), np.asarray(prob_dist)
    refs, margins = [], []
    for b in range(B):
        r, m = ddt_reference(xn[b], Wn, bn, an, pdn, max_depth)
        refs.append(r)
        margins.append(m)
    refs = np.stack(refs)
    margins = np.asarray(margins)

    # Samples whose routing decision sits within 1e-4 of the 0.5 tie are
    # knife-edge (hard branch may legitimately flip across float backends);
    # exclude them and require nearly all samples to be checked.
    checked = margins > 1e-4
    assert checked.mean() > 0.9, "too many knife-edge samples in the test data"
    np.testing.assert_allclose(out_np[checked], refs[checked], rtol=1e-4, atol=1e-5)

    print("KERNEL_OK")
</pallas_src>

<mosaic_0001>
module attributes {stable_mosaic.version = 11 : i64} {
  func.func @_ddt_kernel(%arg0: i32, %arg1: memref<32x128xf32, #tpu.memory_space<vmem>>, %arg2: memref<7x32xf32, #tpu.memory_space<vmem>>, %arg3: memref<7x1xf32, #tpu.memory_space<vmem>>, %arg4: memref<7x1xf32, #tpu.memory_space<vmem>>, %arg5: memref<24x7xf32, #tpu.memory_space<vmem>>, %arg6: memref<24x7xf32, #tpu.memory_space<vmem>>, %arg7: memref<8x8xf32, #tpu.memory_space<vmem>>, %arg8: memref<8x128xf32, #tpu.memory_space<vmem>>) attributes {dimension_semantics = [#tpu.dimension_semantics<parallel>], iteration_bounds = array<i64: 2>, scalar_prefetch = 0 : i64, scratch_operands = 0 : i64, tpu.core_type = #tpu.core_type<tc>, window_params = [{transform_indices = @transform_0, window_bounds = array<i64: 32, 128>}, {pipeline_mode = #tpu.pipeline_mode<synchronous>, transform_indices = @transform_1, window_bounds = array<i64: 7, 32>}, {pipeline_mode = #tpu.pipeline_mode<synchronous>, transform_indices = @transform_2, window_bounds = array<i64: 7, 1>}, {pipeline_mode = #tpu.pipeline_mode<synchronous>, transform_indices = @transform_3, window_bounds = array<i64: 7, 1>}, {pipeline_mode = #tpu.pipeline_mode<synchronous>, transform_indices = @transform_4, window_bounds = array<i64: 24, 7>}, {pipeline_mode = #tpu.pipeline_mode<synchronous>, transform_indices = @transform_5, window_bounds = array<i64: 24, 7>}, {pipeline_mode = #tpu.pipeline_mode<synchronous>, transform_indices = @transform_6, window_bounds = array<i64: 8, 8>}, {transform_indices = @transform_7, window_bounds = array<i64: 8, 128>}]} {
    %c0 = arith.constant 0 : index
    %c0_0 = arith.constant 0 : index
    %0 = vector.load %arg2[%c0, %c0_0] : memref<7x32xf32, #tpu.memory_space<vmem>>, vector<7x32xf32>
    %c0_1 = arith.constant 0 : index
    %c0_2 = arith.constant 0 : index
    %1 = vector.load %arg1[%c0_1, %c0_2] : memref<32x128xf32, #tpu.memory_space<vmem>>, vector<32x128xf32>
    %cst = arith.constant dense<0.000000e+00> : vector<7x128xf32>
    %2 = tpu.matmul %0, %1, %cst {dimension_numbers = #tpu.dot_dimension_numbers<[1], [0], [0], [1], [0, 0, 1, 1], [], []>} : vector<7x32xf32>, vector<32x128xf32>, vector<7x128xf32> -> vector<7x128xf32>
    %c0_3 = arith.constant 0 : index
    %c0_4 = arith.constant 0 : index
    %3 = vector.load %arg4[%c0_3, %c0_4] : memref<7x1xf32, #tpu.memory_space<vmem>>, vector<7x1xf32>
    %c0_5 = arith.constant 0 : index
    %c0_6 = arith.constant 0 : index
    %4 = vector.load %arg3[%c0_5, %c0_6] : memref<7x1xf32, #tpu.memory_space<vmem>>, vector<7x1xf32>
    %5 = vector.broadcast %4 : vector<7x1xf32> to vector<7x128xf32>
    %6 = arith.addf %2, %5 : vector<7x128xf32>
    %7 = vector.broadcast %3 : vector<7x1xf32> to vector<7x128xf32>
    %8 = arith.mulf %7, %6 : vector<7x128xf32>
    %9 = arith.negf %8 : vector<7x128xf32>
    %10 = math.exp %9 : vector<7x128xf32>
    %cst_7 = arith.constant 1.000000e+00 : f32
    %11 = vector.broadcast %cst_7 : f32 to vector<7x128xf32>
    %12 = arith.addf %11, %10 : vector<7x128xf32>
    %13 = arith.divf %11, %12 : vector<7x128xf32>
    %cst_8 = arith.constant 5.000000e-01 : f32
    %14 = vector.broadcast %cst_8 : f32 to vector<7x128xf32>
    %15 = arith.cmpf oge, %13, %14 : vector<7x128xf32>
    %cst_9 = arith.constant 0.000000e+00 : f32
    %16 = vector.broadcast %cst_9 : f32 to vector<7x128xf32>
    %17 = arith.select %15, %13, %16 : vector<7x128xi1>, vector<7x128xf32>
    %cst_10 = arith.constant 1.000000e+00 : f32
    %18 = vector.broadcast %cst_10 : f32 to vector<7x128xf32>
    %19 = arith.subf %18, %13 : vector<7x128xf32>
    %cst_11 = arith.constant 0.000000e+00 : f32
    %20 = vector.broadcast %cst_11 : f32 to vector<7x128xf32>
    %21 = arith.select %15, %20, %19 : vector<7x128xi1>, vector<7x128xf32>
    %c0_12 = arith.constant 0 : index
    %c0_13 = arith.constant 0 : index
    %22 = vector.load %arg5[%c0_12, %c0_13] : memref<24x7xf32, #tpu.memory_space<vmem>>, vector<24x7xf32>
    %cst_14 = arith.constant dense<0.000000e+00> : vector<24x128xf32>
    %23 = tpu.matmul %22, %17, %cst_14 {dimension_numbers = #tpu.dot_dimension_numbers<[1], [0], [0], [1], [0, 0, 1, 1], [], []>} : vector<24x7xf32>, vector<7x128xf32>, vector<24x128xf32> -> vector<24x128xf32>
    %c0_15 = arith.constant 0 : index
    %c0_16 = arith.constant 0 : index
    %24 = vector.load %arg6[%c0_15, %c0_16] : memref<24x7xf32, #tpu.memory_space<vmem>>, vector<24x7xf32>
    %cst_17 = arith.constant dense<0.000000e+00> : vector<24x128xf32>
    %25 = tpu.matmul %24, %21, %cst_17 {dimension_numbers = #tpu.dot_dimension_numbers<[1], [0], [0], [1], [0, 0, 1, 1], [], []>} : vector<24x7xf32>, vector<7x128xf32>, vector<24x128xf32> -> vector<24x128xf32>
    %26 = arith.addf %23, %25 : vector<24x128xf32>
    %27 = vector.extract_strided_slice %26 {offsets = [0, 0], sizes = [8, 128], strides = [1, 1]} : vector<24x128xf32> to vector<8x128xf32>
    %28 = vector.extract_strided_slice %26 {offsets = [8, 0], sizes = [8, 128], strides = [1, 1]} : vector<24x128xf32> to vector<8x128xf32>
    %29 = arith.mulf %27, %28 : vector<8x128xf32>
    %30 = vector.extract_strided_slice %26 {offsets = [16, 0], sizes = [8, 128], strides = [1, 1]} : vector<24x128xf32> to vector<8x128xf32>
    %31 = arith.mulf %29, %30 : vector<8x128xf32>
    %c0_18 = arith.constant 0 : index
    %c0_19 = arith.constant 0 : index
    %32 = vector.load %arg7[%c0_18, %c0_19] : memref<8x8xf32, #tpu.memory_space<vmem>>, vector<8x8xf32>
    %cst_20 = arith.constant dense<0.000000e+00> : vector<8x128xf32>
    %33 = tpu.matmul %32, %31, %cst_20 {dimension_numbers = #tpu.dot_dimension_numbers<[1], [0], [0], [1], [0, 0, 1, 1], [], []>} : vector<8x8xf32>, vector<8x128xf32>, vector<8x128xf32> -> vector<8x128xf32>
    %c0_21 = arith.constant 0 : index
    %c0_22 = arith.constant 0 : index
    %34 = vector.load %arg8[%c0_21, %c0_22] : memref<8x128xf32, #tpu.memory_space<vmem>>, vector<8x128xf32>
    tpu.vector_store %arg8[%c0_21, %c0_22], %33 {strides = array<i32>} : memref<8x128xf32, #tpu.memory_space<vmem>>, vector<8x128xf32>,
    return
  }
  func.func @transform_0(%arg0: i32) -> (i32, i32) {
    %c0_i32 = arith.constant 0 : i32
    %c0_i32_0 = arith.constant 0 : i32
    return %c0_i32, %arg0 : i32, i32
  }
  func.func @transform_1(%arg0: i32) -> (i32, i32) {
    %c0_i32 = arith.constant 0 : i32
    %c0_i32_0 = arith.constant 0 : i32
    %c0_i32_1 = arith.constant 0 : i32
    return %c0_i32, %c0_i32_0 : i32, i32
  }
  func.func @transform_2(%arg0: i32) -> (i32, i32) {
    %c0_i32 = arith.constant 0 : i32
    %c0_i32_0 = arith.constant 0 : i32
    %c0_i32_1 = arith.constant 0 : i32
    return %c0_i32, %c0_i32_0 : i32, i32
  }
  func.func @transform_3(%arg0: i32) -> (i32, i32) {
    %c0_i32 = arith.constant 0 : i32
    %c0_i32_0 = arith.constant 0 : i32
    %c0_i32_1 = arith.constant 0 : i32
    return %c0_i32, %c0_i32_0 : i32, i32
  }
  func.func @transform_4(%arg0: i32) -> (i32, i32) {
    %c0_i32 = arith.constant 0 : i32
    %c0_i32_0 = arith.constant 0 : i32
    %c0_i32_1 = arith.constant 0 : i32
    return %c0_i32, %c0_i32_0 : i32, i32
  }
  func.func @transform_5(%arg0: i32) -> (i32, i32) {
    %c0_i32 = arith.constant 0 : i32
    %c0_i32_0 = arith.constant 0 : i32
    %c0_i32_1 = arith.constant 0 : i32
    return %c0_i32, %c0_i32_0 : i32, i32
  }
  func.func @transform_6(%arg0: i32) -> (i32, i32) {
    %c0_i32 = arith.constant 0 : i32
    %c0_i32_0 = arith.constant 0 : i32
    %c0_i32_1 = arith.constant 0 : i32
    return %c0_i32, %c0_i32_0 : i32, i32
  }
  func.func @transform_7(%arg0: i32) -> (i32, i32) {
    %c0_i32 = arith.constant 0 : i32
    %c0_i32_0 = arith.constant 0 : i32
    return %c0_i32, %arg0 : i32, i32
  }
}

</mosaic_0001>

<bundles_post_ra>
// kernel: tpu_custom_call.1
= control target key start
LH: loop header
LB: loop body
LE: loop exit
PB: predicated region body
PF: predicated region fallthrough
CT: control target
= control target key end

     0   :  { %12 = vsyncpa [#allocation4], 0  ;;  %s1172_s0 = inlined_call_operand.vmem [shape: f32[32,256], index: 0, kind: input, shape index: {}]   ;;  %s1173_s1 = inlined_call_operand.vmem [shape: f32[7,32], index: 1, kind: input, shape index: {}]   ;;  %s1174_s2 = inlined_call_operand.vmem [shape: f32[7,1], index: 2, kind: input, shape index: {}]   ;;  %s1175_s3 = inlined_call_operand.vmem [shape: f32[7,1], index: 3, kind: input, shape index: {}]   ;;  %s1176_s4 = inlined_call_operand.vmem [shape: f32[24,7], index: 4, kind: input, shape index: {}]   ;;  %s1177_s5 = inlined_call_operand.vmem [shape: f32[24,7], index: 5, kind: input, shape index: {}]   ;;  %s1178_s6 = inlined_call_operand.vmem [shape: f32[8,8], index: 6, kind: input, shape index: {}]   ;;  %s1179_s7 = inlined_call_operand.hbm [shape: f32[8,256], index: 7, kind: output, shape index: {}]  }
   0x1   :  { %14 = vsyncpa [#allocation4 + $0x1], 0  ;;  %s1004_s24 = smov 0   ;;  %s1006_s25 = smov 0  }
   0x2   :  { %s1008_s26 = smov 0   ;;  %s1010_s27 = smov 0  }
   0x3 LB: > { %s774_s28 = sadd.s32 4294967295, %s958_s27   ;;  %s775_s29 = sadd.s32 4294967294, %s958_s27   ;;  %s958_s27 = sphi %s1010_s27, %s1185_s27   ;;  %s954_s26 = sphi %s1008_s26, %s1184_s26   ;;  %s950_s25 = sphi %s1006_s25, %s1183_s25   ;;  %s946_s24 = sphi %s1004_s24, %s1182_s24  }
   0x4   : > { %s1027_s30 = sadd.s32 1, %s958_s27   ;;  %s27_s8 = sadd.s32 1, %s954_s26 }
   0x5   : > { %s24_s9 = ssub.s32 %s958_s27, %s1027_s30  ;;  %p34_p0 = scmp.ne.s32.totalorder %s954_s26, %s950_s25 }
   0x6   : > { %p25_p1 = scmp.eq.s32.totalorder %s24_s9, 0  ;;  %p35_p2 = scmp.eq.s32.totalorder %s958_s27, 0 }
   0x7   : > { %p190_p3 = scmp.eq.s32.totalorder %s774_s28, 1  ;;  %p195_p4 = scmp.ne.s32.totalorder %s950_s25, %s946_s24 }
   0x8   : > { %s1040_s10 = scalar_select %p25_p1, %s954_s26, %s27_s8  }
   0x9   : > { %p36_p5 = por %p35_p2, %p34_p0  ;;  %p1042_p6 = por %p190_p3, %p34_p0 }
   0xa   : > { %p196_p7 = scmp.eq.s32.totalorder %s775_s29, 1  ;;  %p777_p9 = scmp.ge.s32.totalorder %s958_s27, 2 }
   0xc   : > { %p1046_p8 = por %p196_p7, %p195_p4  ;;  %230 = sbr.rel (%p777_p9) target bundleno = 23 (0x17), region = 40 }
  0x11   : > { %233 = sbr.rel (!%p36_p5) target bundleno = 23 (0x17), region = 44  ;;  %s235_s13 = sand.u32 (%p36_p5), 1, %s954_s26  }
  0x12   : > { %s779_s14 = sshll.u32 (%p36_p5), %s958_s27, 3  ;;  %s778_s15 = sshll.u32 (%p36_p5), %s235_s13, 5 }
  0x13   : > { %s239_s18 = scalar_lea.vmem (%p36_p5), %s1172_s0, %s779_s14  ;;  %s237_s19 = scalar_lea.vmem (%p36_p5), [#allocation2], %s778_s15 }
  0x14   : > { %v274_v0 = vld [vmem:[%s239_s18] sm:$0xff] (%p36_p5)  ;;  %v276_v1 = vld [vmem:[%s239_s18 + $0x10] sm:$0xff] (%p36_p5) }
  0x15   : > { %v278_v2 = vld [vmem:[%s239_s18 + $0x20] sm:$0xff] (%p36_p5)  ;;  %275 = vst [vmem:[%s237_s19] sm:$0xff] (%p36_p5), %v274_v0  ;;  %277 = vst [vmem:[%s237_s19 + $0x8] sm:$0xff] (%p36_p5), %v276_v1  ;;  %v280_v3 = vld [vmem:[%s239_s18 + $0x30] sm:$0xff] (%p36_p5) }
  0x16   : > { %279 = vst [vmem:[%s237_s19 + $0x10] sm:$0xff] %v278_v2  ;;  %281 = vst [vmem:[%s237_s19 + $0x18] sm:$0xff] %v280_v3 }
  0x17 PF: > { %p780_p10 = scmp.ge.s32.totalorder %s958_s27, 1  ;;  %p286_p11 = scmp.lt.s32.totalorder %s958_s27, 3 }
  0x19   : > { %p287_p12 = pnand %p780_p10, %p286_p11 }
  0x1a   : > { %s1061_s20 = sand.u32 (!%p287_p12), 1, %s950_s25   ;;  %s795_s19 = sshll.u32 (!%p287_p12), %s774_s28, 7 }
  0x1b   : > { %290 = sbr.rel (%p287_p12) target bundleno = 689 (0x2b1), region = 82  ;;  %s781_s21 = sshll.u32 (!%p287_p12), %s1061_s20, 5 }
  0x1c   : > { %s295_s29 = scalar_lea.vmem (!%p287_p12), [#allocation2], %s781_s21  ;;  %s782_s16 = sshll.u32 (!%p287_p12), %s1061_s20, 3 }
  0x1d   : > { %s323_s17 = scalar_lea.vmem (!%p287_p12), [#allocation3], %s782_s16  ;;  %s1131_s23 = scalar_lea.hbm (!%p287_p12), %s1179_s7, %s795_s19 }
  0x1e   : > { %s710_s18 = sshll.u32 (!%p287_p12), %s323_s17, 4  ;;  %s963_s28 = smov (!%p287_p12), [#allocation3]   ;;  %s1126_s18 = int_to_ptr.vmem [resolvable:$true] %s710_s18 }
  0x1f   : > { %s898_s8 = scalar_lea.vmem (!%p287_p12), %s1126_s18, 128  ;;  %s902_s9 = sshll.u32 (!%p287_p12), %s963_s28, 4  ;;  %s903_s9 = int_to_ptr.vmem [resolvable:$false] %s902_s9 }
  0x20   : > { %v960_v4 = vmov 0.0   ;;  %vm961_vm0 = vmmov 0   ;;  %v330_v5 = vld [vmem:[%s1174_s2] sm:$0x7f]  ;;  %v962_v6 = vmov 0   ;;  %v328_v7 = vld [vmem:[%s295_s29 + $0x18] sm:$0xff]  ;;  %p899_p13 = scmp.ne.s32.totalorder %s1126_s18, %s898_s8  ;;  %p905_p2 = scmp.lt.s32.totalorder %s1126_s18, %s903_s9 }
  0x21   : > { %813 = vmatprep.subr.mxu0 %v960_v4  ;;  %821 = vmatprep.mubr.msk.f32.mxu0 %vm961_vm0, %v960_v4  ;;  %v327_v8 = vld [vmem:[%s295_s29 + $0x10] sm:$0xff]  ;;  %v329_v9 = vld [vmem:[%s1175_s3] sm:$0x7f]  ;;  %v326_v10 = vld [vmem:[%s295_s29 + $0x8] sm:$0xff]  ;;  %vm336_vm1 = vcmask 261120   ;;  %vm442_vm2 = vcmask 1046528  }
  0x22   : > { %893 = vset.pattern.permute.xlu0 %v962_v6  ;;  %824 = vmatprep.subr.mxu1 %v960_v4  ;;  %v325_v11 = vld [vmem:[%s295_s29] sm:$0xff]  ;;  %vm432_vm4 = vcmask 56320   ;;  %v427_v28 = vld [vmem:[%s1176_s4 + $0x8] sm:$0xff]  ;;  %v428_v30 = vld [vmem:[%s1176_s4 + $0x10] sm:$0xff]  ;;  %vm621_vm5 = vcmask 64512   ;;  %s697_s29 = scalar_lea.sflag [#allocation4], %s1061_s20  ;;  %p900_p0 = pnand %p899_p13, %p1042_p6 }
  0x23   : > { %333 = vperm.xlu0 %893, %v330_v5   ;;  %826 = vmatprep.mubr.msk.f32.mxu1 %vm961_vm0, %v960_v4  ;;  %v324_v12 = vld [vmem:[%s1173_s1] sm:$0x7f]  ;;  %v430_v29 = vld [vmem:[%s1177_s5 + $0x8] sm:$0xff]  ;;  %v431_v31 = vld [vmem:[%s1177_s5 + $0x10] sm:$0xff]  ;;  %s904_s13 = scalar_lea.vmem %s903_s9, 256 }
  0x24   : > { %814 = vmatpush3.msra.mxu0 %v328_v7  ;;  %v426_v24 = vld [vmem:[%s1176_s4] sm:$0xff]  ;;  %p901_p1 = pneg %p900_p0  ;;  %p906_p3 = scmp.lt.s32.totalorder %s904_s13, %s898_s8 }
  0x25   : > { %815 = vmatprep.subr.mxu0 %v960_v4  ;;  %v429_v26 = vld [vmem:[%s1177_s5] sm:$0xff] }
  0x26   : > { %816 = vmatpush3.msra.mxu0 %v327_v8  ;;  %v620_v49 = vld [vmem:[%s1178_s6] sm:$0xff]  ;;  %p907_p4 = por %p906_p3, %p905_p2 }
  0x27   : > { %817 = vmatprep.subr.mxu0 %v960_v4  ;;  %412 = vperm.xlu0 %893, %v329_v9  }
  0x28   : > { %818 = vmatpush3.msra.mxu0 %v326_v10  ;;  %p908_p5 = pnand %p907_p4, %p901_p1 }
  0x29   : > { %819 = vmatprep.subr.mxu0 %v960_v4 }
  0x2a   : > { %820 = vmatpush3.msra.mxu0 %v325_v11 }
  0x2b   : > { %822 = vmatmul.mubr.msk.f32.vlgmr.msra.gmra.mxu0 %vm336_vm1, %v324_v12  ;;  %835 = vmatprep.subr.mxu0 %v960_v4 }
  0x2c   : > { %837 = vmatprep.mubr.msk.f32.mxu0 %vm961_vm0, %v960_v4 }
  0x9e   : > { %v334_v13 = vpop.permute.xlu0 %333 }
  0xa2   : > { %v413_v16 = vpop.permute.xlu0 %412 }
  0xeb   : > { %v406_v14 = vpop.f32.mrf.mxu0 }
  0xec   : > { %v407_v15 = vadd.f32 %v406_v14, %v334_v13 }
  0xed   : > { %v823_v17 = vpop.f32.mrf.mxu0 }
  0xee   : > { %v415_v18 = vmul.f32 %v413_v16, %v407_v15 }
  0xf0   : > { %v784_v19 = vmul.f32 -1.442695, %v415_v18 }
  0xf2   : > { %894 = vpow2.f32 %v784_v19 }
  0xff   : > { %v895_v20 = vpop.eup %894 }
 0x100   : > { %v419_v21 = vadd.f32 1.0, %v895_v20 }
 0x102   : > { %896 = vrcp.f32 %v419_v21 }
 0x10f   : > { %v897_v22 = vpop.eup %896 }
 0x110   : > { %vm422_vm3 = vcmp.ge.f32.partialorder %v897_v22, 0.5  ;;  %v424_v23 = vsub.f32 1.0, %v897_v22 }
 0x111   : > { %v423_v25 = vsel %vm422_vm3, %v897_v22, 0.0 }
 0x112   : > { %836 = vmatpush3.msk.msra.mxu0 %vm442_vm2, %v423_v25  ;;  %v425_v27 = vsel %vm422_vm3, 0.0, %v424_v23 }
 0x113   : > { %825 = vmatpush3.msk.msra.mxu1 %vm442_vm2, %v425_v27  ;;  %838 = vmatmul.mubr.msk.f32.vlgmr.msra.gmra.mxu0 %vm432_vm4, %v426_v24 }
 0x114   : > { %827 = vmatmul.mubr.msk.f32.vlgmr.msra.gmra.mxu1 %vm432_vm4, %v429_v26  ;;  %840 = vmatprep.mubr.msk.f32.mxu0 %vm961_vm0, %v960_v4 }
 0x115   : > { %829 = vmatprep.mubr.msk.f32.mxu1 %vm961_vm0, %v960_v4  ;;  %846 = vmatprep.subr.mxu1 %v960_v4 }
 0x117   : > { %841 = vmatmul.mubr.msk.f32.gmra.mxu0 %vm432_vm4, %v427_v28 }
 0x118   : > { %830 = vmatmul.mubr.msk.f32.gmra.mxu1 %vm432_vm4, %v430_v29  ;;  %843 = vmatprep.mubr.msk.f32.mxu0 %vm961_vm0, %v960_v4 }
 0x119   : > { %832 = vmatprep.mubr.msk.f32.mxu1 %vm961_vm0, %v960_v4 }
 0x11b   : > { %844 = vmatmul.mubr.msk.f32.gmra.mxu0 %vm432_vm4, %v428_v30 }
 0x11c   : > { %833 = vmatmul.mubr.msk.f32.gmra.mxu1 %vm432_vm4, %v431_v31 }
 0x11d   : > { %848 = vmatprep.mubr.msk.f32.mxu1 %vm961_vm0, %v960_v4 }
 0x1d3   : > { %v604_v32 = vpop.f32.mrf.mxu0 }
 0x1d4   : > { %v512_v33 = vpop.f32.mrf.mxu1 }
 0x1d5   : > { %v839_v34 = vpop.f32.mrf.mxu0  ;;  %v605_v41 = vadd.f32 %v604_v32, %v512_v33 }
 0x1d6   : > { %v828_v35 = vpop.f32.mrf.mxu1 }
 0x1d7   : > { %v609_v36 = vpop.f32.mrf.mxu0 }
 0x1d8   : > { %v517_v37 = vpop.f32.mrf.mxu1 }
 0x1d9   : > { %v610_v38 = vadd.f32 %v609_v36, %v517_v37  ;;  %v842_v39 = vpop.f32.mrf.mxu0 }
 0x1da   : > { %v831_v40 = vpop.f32.mrf.mxu1 }
 0x1db   : > { %v614_v42 = vpop.f32.mrf.mxu0  ;;  %v618_v44 = vmul.f32 %v610_v38, %v605_v41 }
 0x1dc   : > { %v522_v43 = vpop.f32.mrf.mxu1 }
 0x1dd   : > { %v615_v45 = vadd.f32 %v614_v42, %v522_v43  ;;  %v845_v46 = vpop.f32.mrf.mxu0 }
 0x1de   : > { %v834_v47 = vpop.f32.mrf.mxu1 }
 0x1df   : > { %v619_v48 = vmul.f32 %v618_v44, %v615_v45 }
 0x1e1   : > { %847 = vmatpush3.msra.mxu1 %v619_v48 }
 0x1e2   : > { %849 = vmatmul.mubr.msk.f32.vlgmr.msra.gmra.mxu1 %vm621_vm5, %v620_v49 }
 0x2a2   : > { %v691_v50 = vpop.f32.mrf.mxu1 }
 0x2a3   : > { %695 = vst [vmem:[%s323_s17] sm:$0xff] %v691_v50 }
 0x2a4   : > { %v850_v51 = vpop.f32.mrf.mxu1 }
 0x2a5   : > { %911 = shalt.err (!%p908_p5)
}
 0x2a6   : > { %s912_s14 = scalar_lea.hbm %s1131_s23, 128  ;;  %s916_s16 = scalar_lea.hbm %s1179_s7, 256 }
 0x2a7   : > { %p913_p7 = scmp.ne.s32.totalorder %s1131_s23, %s912_s14  ;;  %p917_p12 = scmp.lt.s32.totalorder %s1131_s23, %s1179_s7 }
 0x2a8   : > { %p918_p13 = scmp.lt.s32.totalorder %s916_s16, %s912_s14 }
 0x2a9   : > { %p914_p10 = pnand %p913_p7, %p1042_p6 }
 0x2aa   : > { %p919_p0 = por %p918_p13, %p917_p12 }
 0x2ab   : > { %p915_p11 = pneg %p914_p10 }
 0x2ad   : > { %p920_p1 = pnand %p919_p0, %p915_p11 }
 0x2af   : > { %923 = shalt.err (!%p920_p1)
}
 0x2b0   : > { %851 = dma.vmem_to_hbm [thread:$0]  (%p1042_p6), %s1126_s18, 128, %s1131_s23, %s697_s29  }
 0x2b1 PF: > { %s722_s21 = sand.u32 1, %s946_s24   ;;  %p854_p2 = pnand %p777_p9, %p1046_p8 }
 0x2b2   : > { %s723_s22 = scalar_lea.sflag [#allocation4], %s722_s21 }
 0x2b3   : > { %p855_p3 = pneg %p854_p2 }
 0x2b5   : > { %941 = dma.done.wait (%p855_p3), %s723_s22, 128  }
 0x2b6   : > { %943 = vsyncadd (%p855_p3), %s723_s22, 4294967168  ;;  %p17_p4 = scmp.ge.s32.totalorder %s1027_s30, 4   ;;  %s1182_s24 = smov %s950_s25 }
 0x2b7   : > { %s1183_s25 = smov %s954_s26  ;;  %s1184_s26 = smov %s1040_s10 }
 0x2b8   : > { %s1185_s27 = smov %s1027_s30  ;;  %19 = sbr.rel (!%p17_p4) target bundleno = 3 (0x3), region = 126 }
 0x2bd   :  { %728 = vsyncpa [#allocation4], 1 }
 0x2be   :  { %730 = vsyncpa [#allocation4 + $0x1], 1 }

</bundles_post_ra>
